<compile_context>
chip_gen: v5e
topology: v5e:2x2
jax: 0.10.0
libtpu: 0.0.40
codegen_flags: <defaults>
</compile_context>

<pallas_src>
import functools

import jax
import jax.numpy as jnp
from jax import lax
from jax.experimental import pallas as pl
from jax.experimental.pallas import tpu as pltpu

LN_EPS = 1e-5  # PyTorch nn.LayerNorm default

# Single (input + output) tile-set budget in bytes; double-buffering roughly
# doubles it.  At TM=2048, D=256 this is ~2 MiB -> ~4-5 MiB double-buffered,
# far under v7x's 64 MiB / TC and the 32 MiB scoped limit set below.
_TILE_BUDGET_BYTES = 8 * 1024 * 1024
_TM_CAP = 2048


def _round_up(x, m):
    return (x + m - 1) // m * m


def _choose_tile_rows(n, d, multiple):
    """Row-tile size: as large as the byte budget allows, but keep >= 8 grid
    steps where possible (v7x megacore split + pipeline depth)."""
    tm = _TILE_BUDGET_BYTES // (4 * (d + 3))      # 12 B/row read + 4*D B/row written
    tm = min(tm, _TM_CAP)
    tm = max((tm // multiple) * multiple, multiple)
    while tm > multiple and (n + tm - 1) // tm < 8:
        tm = max(multiple, ((tm // 2) // multiple) * multiple)
    return tm


# ---------------------------------------------------------------------------
# Transposed kernel (lane-dense stores) -- used when output_dim < 128.
#   xT: (3, TM)  w1T: (H, 3)  b1: (H, 1)  w2T: (D, H)  b2/g/beta: (D, 1)
#   out: (D, TM)   (TM is a multiple of 128 -> unmasked vector stores)
# ---------------------------------------------------------------------------
def _mlp_encoder_kernel_tposed(xT_ref, w1T_ref, b1_ref, w2T_ref, b2_ref, g_ref,
                               beta_ref, o_ref, *, inv_d):
    xT = xT_ref[...].astype(jnp.float32)                      # (3, TM)
    w1T = w1T_ref[...]                                         # (H, 3)
    # Linear(3 -> H) + ReLU: three VPU broadcast FMAs (x rows broadcast over
    # sublanes, W1 columns broadcast over lanes).
    h = (w1T[:, 0:1] * xT[0:1, :]
         + w1T[:, 1:2] * xT[1:2, :]
         + w1T[:, 2:3] * xT[2:3, :]
         + b1_ref[...])
    h = jnp.maximum(h, 0.0)                                    # (H, TM)

    # Linear(H -> D) on the MXU: (D, H) @ (H, TM), f32 accumulation.
    y = jnp.dot(w2T_ref[...], h.astype(w2T_ref.dtype),
                preferred_element_type=jnp.float32)
    y = y + b2_ref[...]                                        # (D, TM)

    # LayerNorm over D (sublane axis): single reduction pass, clamped variance.
    s = jnp.sum(y, axis=0, keepdims=True)
    ss = jnp.sum(y * y, axis=0, keepdims=True)
    mean = s * inv_d
    var = jnp.maximum(ss * inv_d - mean * mean, 0.0)
    norm = (y - mean) * lax.rsqrt(var + LN_EPS)
    o_ref[...] = (norm * g_ref[...] + beta_ref[...]).astype(o_ref.dtype)


# ---------------------------------------------------------------------------
# Row-major kernel -- used when output_dim >= 128 (already lane-dense).
#   x: (TM, 3)  w1: (3, H)  b1: (1, H)  w2: (H, D)  b2/g/beta: (1, D)
#   out: (TM, D)
# ---------------------------------------------------------------------------
def _mlp_encoder_kernel_rows(x_ref, w1_ref, b1_ref, w2_ref, b2_ref, g_ref,
                             beta_ref, o_ref, *, inv_d):
    x = x_ref[...].astype(jnp.float32)                         # (TM, 3)
    w1 = w1_ref[...]                                           # (3, H)
    h = (x[:, 0:1] * w1[0:1, :]
         + x[:, 1:2] * w1[1:2, :]
         + x[:, 2:3] * w1[2:3, :]
         + b1_ref[...])
    h = jnp.maximum(h, 0.0)                                    # (TM, H)

    y = jnp.dot(h.astype(w2_ref.dtype), w2_ref[...],
                preferred_element_type=jnp.float32)
    y = y + b2_ref[...]                                        # (TM, D)

    s = jnp.sum(y, axis=-1, keepdims=True)
    ss = jnp.sum(y * y, axis=-1, keepdims=True)
    mean = s * inv_d
    var = jnp.maximum(ss * inv_d - mean * mean, 0.0)
    norm = (y - mean) * lax.rsqrt(var + LN_EPS)
    o_ref[...] = (norm * g_ref[...] + beta_ref[...]).astype(o_ref.dtype)


@functools.partial(jax.jit, static_argnames=("output_dim",))
def positional_encoder_mlp(positions, params, *, output_dim):
    """positions: [..., 3] float32 -> [..., output_dim] float32."""
    assert output_dim % 2 == 0, "output_dim must be even for the mlp encoder"
    w1, b1, w2, b2, gamma, beta = params
    lead_shape = positions.shape[:-1]
    n = 1
    for s in lead_shape:
        n *= s
    x2d = positions.reshape(n, 3).astype(jnp.float32)

    hidden = output_dim // 2
    # bf16 layer-2 matmul only when D is large enough that the matmul is
    # visible; tiny D (e.g. 32) stays f32 for accuracy.
    use_bf16 = output_dim >= 256
    w2_dtype = jnp.bfloat16 if use_bf16 else jnp.float32

    transposed = output_dim < 128          # lane-dense (D, TM) store path
    multiple = 128 if transposed else 8
    TM = _choose_tile_rows(n, output_dim, multiple)
    n_pad = _round_up(max(n, TM), TM)
    if n_pad != n:
        x2d = jnp.pad(x2d, ((0, n_pad - n), (0, 0)))
    grid = (n_pad // TM,)

    compiler_params = pltpu.CompilerParams(
        dimension_semantics=("parallel",),          # megacore sharding
        vmem_limit_bytes=32 * 1024 * 1024)          # explicit (v5e default is 16 MiB)

    if transposed:
        kernel = functools.partial(_mlp_encoder_kernel_tposed,
                                   inv_d=1.0 / output_dim)
        out_t = pl.pallas_call(
            kernel,
            out_shape=jax.ShapeDtypeStruct((output_dim, n_pad), jnp.float32),
            grid_spec=pltpu.PrefetchScalarGridSpec(
                num_scalar_prefetch=0,
                grid=grid,
                in_specs=[
                    pl.BlockSpec((3, TM), lambda i: (0, i)),                 # x^T (tiled)
                    pl.BlockSpec((hidden, 3), lambda i: (0, 0)),             # W1^T (resident)
                    pl.BlockSpec((hidden, 1), lambda i: (0, 0)),             # b1 (resident)
                    pl.BlockSpec((output_dim, hidden), lambda i: (0, 0)),    # W2^T (resident)
                    pl.BlockSpec((output_dim, 1), lambda i: (0, 0)),         # b2 (resident)
                    pl.BlockSpec((output_dim, 1), lambda i: (0, 0)),         # gamma (resident)
                    pl.BlockSpec((output_dim, 1), lambda i: (0, 0)),         # beta (resident)
                ],
                out_specs=pl.BlockSpec((output_dim, TM), lambda i: (0, i)),
            ),
            compiler_params=compiler_params,
        )(x2d.T, w1.T, b1.reshape(hidden, 1), w2.T.astype(w2_dtype),
          b2.reshape(output_dim, 1), gamma.reshape(output_dim, 1),
          beta.reshape(output_dim, 1))
        # Wrapper-side layout fix-up (fuse/skip if the consumer accepts (D, N)).
        out = out_t.T[:n]
    else:
        kernel = functools.partial(_mlp_encoder_kernel_rows,
                                   inv_d=1.0 / output_dim)
        out = pl.pallas_call(
            kernel,
            out_shape=jax.ShapeDtypeStruct((n_pad, output_dim), jnp.float32),
            grid_spec=pltpu.PrefetchScalarGridSpec(
                num_scalar_prefetch=0,
                grid=grid,
                in_specs=[
                    pl.BlockSpec((TM, 3), lambda i: (i, 0)),                 # x (tiled)
                    pl.BlockSpec((3, hidden), lambda i: (0, 0)),             # W1 (resident)
                    pl.BlockSpec((1, hidden), lambda i: (0, 0)),             # b1 (resident)
                    pl.BlockSpec((hidden, output_dim), lambda i: (0, 0)),    # W2 (resident)
                    pl.BlockSpec((1, output_dim), lambda i: (0, 0)),         # b2 (resident)
                    pl.BlockSpec((1, output_dim), lambda i: (0, 0)),         # gamma (resident)
                    pl.BlockSpec((1, output_dim), lambda i: (0, 0)),         # beta (resident)
                ],
                out_specs=pl.BlockSpec((TM, output_dim), lambda i: (i, 0)),
            ),
            compiler_params=compiler_params,
        )(x2d, w1, b1.reshape(1, hidden), w2.astype(w2_dtype),
          b2.reshape(1, output_dim), gamma.reshape(1, output_dim),
          beta.reshape(1, output_dim))
        out = out[:n]

    return out.reshape(*lead_shape, output_dim)


def init_params(key, output_dim):
    """Deterministic init mimicking PyTorch Linear defaults (uniform +-1/sqrt(fan_in))."""
    hidden = output_dim // 2
    k1, k2, k3, k4 = jax.random.split(key, 4)
    lim1 = 1.0 / jnp.sqrt(3.0)
    lim2 = 1.0 / jnp.sqrt(float(hidden))
    w1 = jax.random.uniform(k1, (3, hidden), jnp.float32, -lim1, lim1)
    b1 = jax.random.uniform(k2, (hidden,), jnp.float32, -lim1, lim1)
    w2 = jax.random.uniform(k3, (hidden, output_dim), jnp.float32, -lim2, lim2)
    b2 = jax.random.uniform(k4, (output_dim,), jnp.float32, -lim2, lim2)
    gamma = jnp.ones((output_dim,), jnp.float32)   # LayerNorm weight
    beta = jnp.zeros((output_dim,), jnp.float32)   # LayerNorm bias
    return (w1, b1, w2, b2, gamma, beta)


def _reference(positions, params):
    """Pure-JAX reference for sanity checking."""
    w1, b1, w2, b2, gamma, beta = params
    h = jnp.maximum(positions @ w1 + b1, 0.0)
    y = h @ w2 + b2
    mean = jnp.mean(y, axis=-1, keepdims=True)
    var = jnp.mean((y - mean) ** 2, axis=-1, keepdims=True)
    return (y - mean) / jnp.sqrt(var + LN_EPS) * gamma + beta


if __name__ == "__main__":
    BATCH, SEQ = 2, 8        # positions: [2, 8, 3]
    key = jax.random.PRNGKey(0)
    k_pos, k_par = jax.random.split(key)
    positions = jax.random.normal(k_pos, (BATCH, SEQ, 3), jnp.float32)

    ok = True
    # D = 32  -> exercises the transposed lane-dense-store path (D < 128).
    # D = 128 -> exercises the row-major path (already lane-dense).
    for output_dim in (32, 128):
        params = init_params(k_par, output_dim)
        out = positional_encoder_mlp(positions, params, output_dim=output_dim)
        out = jax.block_until_ready(out)
        ref = _reference(positions, params)
        assert out.shape == (BATCH, SEQ, output_dim), out.shape
        ok &= bool(jnp.allclose(out, ref, atol=1e-4, rtol=1e-4))

    assert ok, "mismatch vs reference"
    print("KERNEL_OK")
</pallas_src>

<mosaic_0001>
module attributes {stable_mosaic.version = 11 : i64} {
  func.func @_mlp_encoder_kernel_tposed(%arg0: i32, %arg1: memref<3x128xf32, #tpu.memory_space<vmem>>, %arg2: memref<16x3xf32, #tpu.memory_space<vmem>>, %arg3: memref<16x1xf32, #tpu.memory_space<vmem>>, %arg4: memref<32x16xf32, #tpu.memory_space<vmem>>, %arg5: memref<32x1xf32, #tpu.memory_space<vmem>>, %arg6: memref<32x1xf32, #tpu.memory_space<vmem>>, %arg7: memref<32x1xf32, #tpu.memory_space<vmem>>, %arg8: memref<32x128xf32, #tpu.memory_space<vmem>>) attributes {dimension_semantics = [#tpu.dimension_semantics<parallel>], iteration_bounds = array<i64: 1>, scalar_prefetch = 0 : i64, scratch_operands = 0 : i64, tpu.core_type = #tpu.core_type<tc>, window_params = [{transform_indices = @transform_0, window_bounds = array<i64: 3, 128>}, {pipeline_mode = #tpu.pipeline_mode<synchronous>, transform_indices = @transform_1, window_bounds = array<i64: 16, 3>}, {pipeline_mode = #tpu.pipeline_mode<synchronous>, transform_indices = @transform_2, window_bounds = array<i64: 16, 1>}, {pipeline_mode = #tpu.pipeline_mode<synchronous>, transform_indices = @transform_3, window_bounds = array<i64: 32, 16>}, {pipeline_mode = #tpu.pipeline_mode<synchronous>, transform_indices = @transform_4, window_bounds = array<i64: 32, 1>}, {pipeline_mode = #tpu.pipeline_mode<synchronous>, transform_indices = @transform_5, window_bounds = array<i64: 32, 1>}, {pipeline_mode = #tpu.pipeline_mode<synchronous>, transform_indices = @transform_6, window_bounds = array<i64: 32, 1>}, {transform_indices = @transform_7, window_bounds = array<i64: 32, 128>}]} {
    %c0 = arith.constant 0 : index
    %c0_0 = arith.constant 0 : index
    %0 = vector.load %arg1[%c0, %c0_0] : memref<3x128xf32, #tpu.memory_space<vmem>>, vector<3x128xf32>
    %c0_1 = arith.constant 0 : index
    %c0_2 = arith.constant 0 : index
    %1 = vector.load %arg2[%c0_1, %c0_2] : memref<16x3xf32, #tpu.memory_space<vmem>>, vector<16x3xf32>
    %2 = vector.extract_strided_slice %1 {offsets = [0, 0], sizes = [16, 1], strides = [1, 1]} : vector<16x3xf32> to vector<16x1xf32>
    %3 = vector.extract_strided_slice %0 {offsets = [0, 0], sizes = [1, 128], strides = [1, 1]} : vector<3x128xf32> to vector<1x128xf32>
    %4 = vector.broadcast %2 : vector<16x1xf32> to vector<16x128xf32>
    %5 = vector.broadcast %3 : vector<1x128xf32> to vector<16x128xf32>
    %6 = arith.mulf %4, %5 : vector<16x128xf32>
    %7 = vector.extract_strided_slice %1 {offsets = [0, 1], sizes = [16, 1], strides = [1, 1]} : vector<16x3xf32> to vector<16x1xf32>
    %8 = vector.extract_strided_slice %0 {offsets = [1, 0], sizes = [1, 128], strides = [1, 1]} : vector<3x128xf32> to vector<1x128xf32>
    %9 = vector.broadcast %7 : vector<16x1xf32> to vector<16x128xf32>
    %10 = vector.broadcast %8 : vector<1x128xf32> to vector<16x128xf32>
    %11 = arith.mulf %9, %10 : vector<16x128xf32>
    %12 = arith.addf %6, %11 : vector<16x128xf32>
    %13 = vector.extract_strided_slice %1 {offsets = [0, 2], sizes = [16, 1], strides = [1, 1]} : vector<16x3xf32> to vector<16x1xf32>
    %14 = vector.extract_strided_slice %0 {offsets = [2, 0], sizes = [1, 128], strides = [1, 1]} : vector<3x128xf32> to vector<1x128xf32>
    %15 = vector.broadcast %13 : vector<16x1xf32> to vector<16x128xf32>
    %16 = vector.broadcast %14 : vector<1x128xf32> to vector<16x128xf32>
    %17 = arith.mulf %15, %16 : vector<16x128xf32>
    %18 = arith.addf %12, %17 : vector<16x128xf32>
    %c0_3 = arith.constant 0 : index
    %c0_4 = arith.constant 0 : index
    %19 = vector.load %arg3[%c0_3, %c0_4] : memref<16x1xf32, #tpu.memory_space<vmem>>, vector<16x1xf32>
    %20 = vector.broadcast %19 : vector<16x1xf32> to vector<16x128xf32>
    %21 = arith.addf %18, %20 : vector<16x128xf32>
    %cst = arith.constant 0.000000e+00 : f32
    %22 = vector.broadcast %cst : f32 to vector<16x128xf32>
    %23 = arith.maximumf %21, %22 : vector<16x128xf32>
    %c0_5 = arith.constant 0 : index
    %c0_6 = arith.constant 0 : index
    %24 = vector.load %arg4[%c0_5, %c0_6] : memref<32x16xf32, #tpu.memory_space<vmem>>, vector<32x16xf32>
    %cst_7 = arith.constant dense<0.000000e+00> : vector<32x128xf32>
    %25 = tpu.matmul %24, %23, %cst_7 {dimension_numbers = #tpu.dot_dimension_numbers<[1], [0], [0], [1], [0, 0, 1, 1], [], []>} : vector<32x16xf32>, vector<16x128xf32>, vector<32x128xf32> -> vector<32x128xf32>
    %c0_8 = arith.constant 0 : index
    %c0_9 = arith.constant 0 : index
    %26 = vector.load %arg5[%c0_8, %c0_9] : memref<32x1xf32, #tpu.memory_space<vmem>>, vector<32x1xf32>
    %27 = vector.broadcast %26 : vector<32x1xf32> to vector<32x128xf32>
    %28 = arith.addf %25, %27 : vector<32x128xf32>
    %cst_10 = arith.constant dense<0.000000e+00> : vector<128xf32>
    %29 = vector.multi_reduction <add>, %28, %cst_10 [0] : vector<32x128xf32> to vector<128xf32>
    %30 = vector.shape_cast %29 : vector<128xf32> to vector<1x128xf32>
    %31 = arith.mulf %28, %28 : vector<32x128xf32>
    %cst_11 = arith.constant dense<0.000000e+00> : vector<128xf32>
    %32 = vector.multi_reduction <add>, %31, %cst_11 [0] : vector<32x128xf32> to vector<128xf32>
    %33 = vector.shape_cast %32 : vector<128xf32> to vector<1x128xf32>
    %cst_12 = arith.constant 3.125000e-02 : f32
    %34 = vector.broadcast %cst_12 : f32 to vector<1x128xf32>
    %35 = arith.mulf %30, %34 : vector<1x128xf32>
    %cst_13 = arith.constant 3.125000e-02 : f32
    %36 = vector.broadcast %cst_13 : f32 to vector<1x128xf32>
    %37 = arith.mulf %33, %36 : vector<1x128xf32>
    %38 = arith.mulf %35, %35 : vector<1x128xf32>
    %39 = arith.subf %37, %38 : vector<1x128xf32>
    %cst_14 = arith.constant 0.000000e+00 : f32
    %40 = vector.broadcast %cst_14 : f32 to vector<1x128xf32>
    %41 = arith.maximumf %39, %40 : vector<1x128xf32>
    %42 = vector.broadcast %35 : vector<1x128xf32> to vector<32x128xf32>
    %43 = arith.subf %28, %42 : vector<32x128xf32>
    %cst_15 = arith.constant 9.99999974E-6 : f32
    %44 = vector.broadcast %cst_15 : f32 to vector<1x128xf32>
    %45 = arith.addf %41, %44 : vector<1x128xf32>
    %46 = math.rsqrt %45 : vector<1x128xf32>
    %47 = vector.broadcast %46 : vector<1x128xf32> to vector<32x128xf32>
    %48 = arith.mulf %43, %47 : vector<32x128xf32>
    %c0_16 = arith.constant 0 : index
    %c0_17 = arith.constant 0 : index
    %49 = vector.load %arg6[%c0_16, %c0_17] : memref<32x1xf32, #tpu.memory_space<vmem>>, vector<32x1xf32>
    %50 = vector.broadcast %49 : vector<32x1xf32> to vector<32x128xf32>
    %51 = arith.mulf %48, %50 : vector<32x128xf32>
    %c0_18 = arith.constant 0 : index
    %c0_19 = arith.constant 0 : index
    %52 = vector.load %arg7[%c0_18, %c0_19] : memref<32x1xf32, #tpu.memory_space<vmem>>, vector<32x1xf32>
    %53 = vector.broadcast %52 : vector<32x1xf32> to vector<32x128xf32>
    %54 = arith.addf %51, %53 : vector<32x128xf32>
    %c0_20 = arith.constant 0 : index
    %c0_21 = arith.constant 0 : index
    %55 = vector.load %arg8[%c0_20, %c0_21] : memref<32x128xf32, #tpu.memory_space<vmem>>, vector<32x128xf32>
    tpu.vector_store %arg8[%c0_20, %c0_21], %54 {strides = array<i32>} : memref<32x128xf32, #tpu.memory_space<vmem>>, vector<32x128xf32>,
    return
  }
  func.func @transform_0(%arg0: i32) -> (i32, i32) {
    %c0_i32 = arith.constant 0 : i32
    %c0_i32_0 = arith.constant 0 : i32
    return %c0_i32, %arg0 : i32, i32
  }
  func.func @transform_1(%arg0: i32) -> (i32, i32) {
    %c0_i32 = arith.constant 0 : i32
    %c0_i32_0 = arith.constant 0 : i32
    %c0_i32_1 = arith.constant 0 : i32
    return %c0_i32, %c0_i32_0 : i32, i32
  }
  func.func @transform_2(%arg0: i32) -> (i32, i32) {
    %c0_i32 = arith.constant 0 : i32
    %c0_i32_0 = arith.constant 0 : i32
    %c0_i32_1 = arith.constant 0 : i32
    return %c0_i32, %c0_i32_0 : i32, i32
  }
  func.func @transform_3(%arg0: i32) -> (i32, i32) {
    %c0_i32 = arith.constant 0 : i32
    %c0_i32_0 = arith.constant 0 : i32
    %c0_i32_1 = arith.constant 0 : i32
    return %c0_i32, %c0_i32_0 : i32, i32
  }
  func.func @transform_4(%arg0: i32) -> (i32, i32) {
    %c0_i32 = arith.constant 0 : i32
    %c0_i32_0 = arith.constant 0 : i32
    %c0_i32_1 = arith.constant 0 : i32
    return %c0_i32, %c0_i32_0 : i32, i32
  }
  func.func @transform_5(%arg0: i32) -> (i32, i32) {
    %c0_i32 = arith.constant 0 : i32
    %c0_i32_0 = arith.constant 0 : i32
    %c0_i32_1 = arith.constant 0 : i32
    return %c0_i32, %c0_i32_0 : i32, i32
  }
  func.func @transform_6(%arg0: i32) -> (i32, i32) {
    %c0_i32 = arith.constant 0 : i32
    %c0_i32_0 = arith.constant 0 : i32
    %c0_i32_1 = arith.constant 0 : i32
    return %c0_i32, %c0_i32_0 : i32, i32
  }
  func.func @transform_7(%arg0: i32) -> (i32, i32) {
    %c0_i32 = arith.constant 0 : i32
    %c0_i32_0 = arith.constant 0 : i32
    return %c0_i32, %arg0 : i32, i32
  }
}

</mosaic_0001>

<bundles_post_ra>
// kernel: positional_encoder_mlp.1
= control target key start
LH: loop header
LB: loop body
LE: loop exit
PB: predicated region body
PF: predicated region fallthrough
CT: control target
= control target key end

     0   :  { %v287_v0 = vmov 2   ;;  %v288_v1 = vmov 0   ;;  %v289_v4 = vmov 1   ;;  %vm112_vm0 = vcmask 130048   ;;  %s405_s1 = inlined_call_operand.vmem [shape: f32[16,3], index: 1, kind: input, shape index: {}]   ;;  %s406_s2 = inlined_call_operand.vmem [shape: f32[16,1], index: 2, kind: input, shape index: {}]   ;;  %s407_s4 = inlined_call_operand.vmem [shape: f32[32,1], index: 4, kind: input, shape index: {}]   ;;  %s408_s5 = inlined_call_operand.vmem [shape: f32[32,1], index: 5, kind: input, shape index: {}]   ;;  %s409_s6 = inlined_call_operand.vmem [shape: f32[32,1], index: 6, kind: input, shape index: {}]   ;;  %s410_s0 = inlined_call_operand.vmem [shape: f32[3,128], index: 0, kind: input, shape index: {}]   ;;  %s411_s3 = inlined_call_operand.vmem [shape: f32[32,16], index: 3, kind: input, shape index: {}]   ;;  %s412_s7 = inlined_call_operand.vmem [shape: f32[32,128], index: 7, kind: output, shape index: {}]  }
   0x1   :  { %281 = vset.pattern.permute.xlu2 %v287_v0  ;;  %279 = vset.pattern.permute.xlu1 %v288_v1  ;;  %v28_v2 = vld [vmem:[%s405_s1 + $0x8] sm:$0xff]  ;;  %v27_v3 = vld [vmem:[%s405_s1] sm:$0xff]  ;;  %v90_v7 = vld [vmem:[%s407_s4 + $0x10] sm:$0xff] }
   0x2   :  { %277 = vset.pattern.permute.xlu0 %v288_v1  ;;  %60 = vperm.xlu2 %281, %v28_v2   ;;  %v68_v5 = vld [vmem:[%s406_s2] sm:$0xff]  ;;  %v69_v6 = vld [vmem:[%s406_s2 + $0x8] sm:$0xff]  ;;  %v91_v10 = vld [vmem:[%s407_s4 + $0x18] sm:$0xff] }
   0x3   :  { %36 = vperm.xlu0 %277, %v28_v2   ;;  %31 = vperm.xlu1 %279, %v27_v3   ;;  %v89_v8 = vld [vmem:[%s407_s4 + $0x8] sm:$0xff]  ;;  %v200_v9 = vld [vmem:[%s408_s5] sm:$0xff]  ;;  %v203_v11 = vld [vmem:[%s408_s5 + $0x18] sm:$0xff] }
   0x4   :  { %v202_v12 = vld [vmem:[%s408_s5 + $0x10] sm:$0xff]  ;;  %v229_v14 = vld [vmem:[%s409_s6 + $0x8] sm:$0xff]  ;;  %v88_v15 = vld [vmem:[%s407_s4] sm:$0xff] }
   0x5   :  { %v230_v13 = vld [vmem:[%s409_s6 + $0x10] sm:$0xff]  ;;  %v201_v16 = vld [vmem:[%s408_s5 + $0x8] sm:$0xff]  ;;  %v228_v18 = vld [vmem:[%s409_s6] sm:$0xff] }
   0x6   :  { %v26_v21 = vld [vmem:[%s410_s0] sm:$0x7]  ;;  %v231_v24 = vld [vmem:[%s409_s6 + $0x18] sm:$0xff]  ;;  %v85_v46 = vld [vmem:[%s411_s3 + $0x8] sm:$0xff] }
   0x7   :  { %v50_v22 = vperm.slane %v26_v21, 1  ;;  %v39_v23 = vperm.slane %v26_v21, 0  ;;  %v63_v26 = vperm.slane %v26_v21, 2  ;;  %v84_v45 = vld [vmem:[%s411_s3] sm:$0xff]  ;;  %v86_v47 = vld [vmem:[%s411_s3 + $0x10] sm:$0xff]  ;;  %v87_v48 = vld [vmem:[%s411_s3 + $0x18] sm:$0xff] }
   0xa   :  { %56 = vperm.xlu2 %281, %v27_v3  }
   0xb   :  { %278 = vset.pattern.permute.xlu0 %v289_v4  ;;  %280 = vset.pattern.permute.xlu1 %v289_v4 }
   0xc   :  { %47 = vperm.xlu0 %278, %v28_v2   ;;  %43 = vperm.xlu1 %280, %v27_v3  }
  0x12   :  { %283 = vset.pattern.permute.xlu2 %v288_v1 }
  0x13   :  { %72 = vperm.xlu2 %283, %v68_v5  }
  0x14   :  { %282 = vset.pattern.permute.xlu1 %v288_v1  ;;  %284 = vset.pattern.permute.xlu0 %v288_v1 }
  0x15   :  { %77 = vperm.xlu1 %282, %v69_v6   ;;  %94 = vperm.xlu0 %284, %v88_v15  }
  0x1b   :  { %104 = vperm.xlu2 %283, %v90_v7  }
  0x1d   :  { %99 = vperm.xlu1 %282, %v89_v8   ;;  %211 = vperm.xlu0 %284, %v201_v16  }
  0x23   :  { %206 = vperm.xlu2 %283, %v200_v9  }
  0x25   :  { %109 = vperm.xlu1 %282, %v91_v10   ;;  %234 = vperm.xlu0 %284, %v228_v18  }
  0x2b   :  { %221 = vperm.xlu2 %283, %v203_v11  }
  0x2d   :  { %216 = vperm.xlu1 %282, %v202_v12   ;;  %249 = vperm.xlu0 %284, %v231_v24  }
  0x33   :  { %244 = vperm.xlu2 %283, %v230_v13  }
  0x35   :  { %239 = vperm.xlu1 %282, %v229_v14  }
  0x5c   :  { %v61_v17 = vpop.permute.xlu2 %60 }
  0x5d   :  { %v65_v36 = vmul.f32 %v63_v26, %v61_v17 }
  0x64   :  { %v57_v25 = vpop.permute.xlu2 %56 }
  0x65   :  { %v64_v33 = vmul.f32 %v63_v26, %v57_v25 }
  0x6d   :  { %v73_v39 = vpop.permute.xlu2 %72 }
  0x75   :  { %v32_v19 = vpop.permute.xlu1 %31  ;;  %v37_v20 = vpop.permute.xlu0 %36 }
  0x76   :  { %v40_v30 = vmul.f32 %v39_v23, %v32_v19  ;;  %v41_v31 = vmul.f32 %v39_v23, %v37_v20  ;;  %v105_v55 = vpop.permute.xlu2 %104 }
  0x7e   :  { %v48_v27 = vpop.permute.xlu0 %47  ;;  %v44_v29 = vpop.permute.xlu1 %43 }
  0x7f   :  { %v52_v28 = vmul.f32 %v50_v22, %v48_v27  ;;  %v51_v32 = vmul.f32 %v50_v22, %v44_v29  ;;  %v207_v25 = vpop.permute.xlu2 %206 }
  0x81   :  { %v54_v34 = vadd.f32 %v52_v28, %v41_v31  ;;  %v53_v35 = vadd.f32 %v51_v32, %v40_v30 }
  0x83   :  { %v66_v37 = vadd.f32 %v64_v33, %v53_v35  ;;  %v67_v38 = vadd.f32 %v65_v36, %v54_v34 }
  0x85   :  { %v80_v41 = vadd.f32 %v73_v39, %v66_v37 }
  0x87   :  { %v78_v40 = vpop.permute.xlu1 %77  ;;  %v82_v44 = vmax.f32 %v80_v41, 0.0  ;;  %v95_v52 = vpop.permute.xlu0 %94 }
  0x88   :  { %v81_v42 = vadd.f32 %v78_v40, %v67_v38  ;;  %v222_v30 = vpop.permute.xlu2 %221 }
  0x8a   :  { %v83_v43 = vmax.f32 %v81_v42, 0.0 }
  0x8c   :  { %139 = vmatpush.msra.mxu0 %v83_v43  ;;  %268 = vmatpush.msra.mxu1 %v83_v43 }
  0x8d   :  { %269 = vmatpush.msra.mxu2 %v83_v43  ;;  %270 = vmatpush.msra.mxu3 %v83_v43 }
  0x8e   :  { %140 = vmatpush.msra.mxu0 %v82_v44  ;;  %271 = vmatpush.msra.mxu1 %v82_v44 }
  0x8f   :  { %272 = vmatpush.msra.mxu2 %v82_v44  ;;  %273 = vmatpush.msra.mxu3 %v82_v44  ;;  %v100_v49 = vpop.permute.xlu1 %99  ;;  %v212_v26 = vpop.permute.xlu0 %211 }
  0x90   :  { %264 = vmatmul.msk.f32.vlgmr.msra.gmra.mxu0 %vm112_vm0, %v84_v45  ;;  %265 = vmatmul.msk.f32.vlgmr.msra.gmra.mxu1 %vm112_vm0, %v85_v46 }
  0x91   :  { %266 = vmatmul.msk.f32.vlgmr.msra.gmra.mxu2 %vm112_vm0, %v86_v47  ;;  %267 = vmatmul.msk.f32.vlgmr.msra.gmra.mxu3 %vm112_vm0, %v87_v48 }
  0x97   :  { %v110_v56 = vpop.permute.xlu1 %109  ;;  %v235_v33 = vpop.permute.xlu0 %234 }
  0x9f   :  { %v217_v31 = vpop.permute.xlu1 %216 }
 0x10d   :  { %v142_v50 = vpop.f32.mrf.mxu0  ;;  %v145_v51 = vpop.f32.mrf.mxu1 }
 0x10e   :  { %v143_v53 = vadd.f32 %v142_v50, %v95_v52  ;;  %v146_v54 = vadd.f32 %v145_v51, %v100_v49  ;;  %v245_v49 = vpop.permute.xlu2 %244  ;;  %v240_v50 = vpop.permute.xlu1 %239 }
 0x10f   :  { %v250_v51 = vpop.permute.xlu0 %249 }
 0x110   :  { %v163_v57 = vmul.f32 %v143_v53, %v143_v53  ;;  %v164_v58 = vmul.f32 %v146_v54, %v146_v54  ;;  %v154_v61 = vadd.f32 %v146_v54, %v143_v53 }
 0x112   :  { %v167_v0 = vadd.f32 %v164_v58, %v163_v57 }
 0x114   :  { %v148_v59 = vpop.f32.mrf.mxu2  ;;  %v151_v60 = vpop.f32.mrf.mxu3 }
 0x115   :  { %v149_v62 = vadd.f32 %v148_v59, %v105_v55  ;;  %v152_v63 = vadd.f32 %v151_v60, %v110_v56 }
 0x117   :  { %v155_v1 = vadd.f32 %v154_v61, %v149_v62  ;;  %v165_v2 = vmul.f32 %v149_v62, %v149_v62  ;;  %v166_v5 = vmul.f32 %v152_v63, %v152_v63 }
 0x119   :  { %v168_v3 = vadd.f32 %v167_v0, %v165_v2  ;;  %v156_v4 = vadd.f32 %v155_v1, %v152_v63 }
 0x11b   :  { %v157_v6 = vrot.slane %v156_v4, 4  ;;  %v169_v7 = vadd.f32 %v168_v3, %v166_v5 }
 0x11d   :  { %v158_v8 = vadd.f32 %v157_v6, %v156_v4  ;;  %v170_v9 = vrot.slane %v169_v7, 4 }
 0x11f   :  { %v159_v10 = vrot.slane %v158_v8, 2  ;;  %v171_v11 = vadd.f32 %v170_v9, %v169_v7 }
 0x121   :  { %v160_v12 = vadd.f32 %v159_v10, %v158_v8  ;;  %v172_v13 = vrot.slane %v171_v11, 2 }
 0x123   :  { %v161_v14 = vrot.slane %v160_v12, 1  ;;  %v173_v15 = vadd.f32 %v172_v13, %v171_v11 }
 0x125   :  { %v162_v16 = vadd.f32 %v161_v14, %v160_v12  ;;  %v174_v17 = vrot.slane %v173_v15, 1 }
 0x127   :  { %v175_v18 = vadd.f32 %v174_v17, %v173_v15  ;;  %v176_v19 = vmul.f32 0.03125, %v162_v16 }
 0x129   :  { %v177_v20 = vmul.f32 0.03125, %v175_v18  ;;  %v178_v21 = vmul.f32 %v176_v19, %v176_v19  ;;  %v181_v36 = vsub.f32 %v143_v53, %v176_v19  ;;  %v182_v37 = vsub.f32 %v146_v54, %v176_v19 }
 0x12a   :  { %v183_v38 = vsub.f32 %v149_v62, %v176_v19  ;;  %v184_v39 = vsub.f32 %v152_v63, %v176_v19 }
 0x12b   :  { %v179_v22 = vsub.f32 %v177_v20, %v178_v21 }
 0x12d   :  { %v180_v23 = vmax.f32 %v179_v22, 0.0 }
 0x12f   :  { %v185_v24 = vadd.f32 1e-05, %v180_v23 }
 0x131   :  { %285 = vrsqrt.f32 %v185_v24  ;;  %vm192_vm2 = vweird.f32 %v185_v24 }
 0x137   :  { %v286_v27 = vpop.eup %285 }
 0x138   :  { %v187_v28 = vmul.f32 %v286_v27, %v185_v24  ;;  %vm193_vm1 = vweird.f32 %v286_v27 }
 0x139   :  { %vm194_vm3 = vmor %vm192_vm2, %vm193_vm1 }
 0x13a   :  { %v188_v29 = vmul.f32 %v286_v27, %v187_v28 }
 0x13c   :  { %v189_v32 = vmul.f32 0.5, %v188_v29 }
 0x13e   :  { %v190_v34 = vsub.f32 1.5, %v189_v32 }
 0x140   :  { %v191_v35 = vmul.f32 %v286_v27, %v190_v34 }
 0x142   :  { %v195_v40 = vsel %vm194_vm3, %v286_v27, %v191_v35 }
 0x143   :  { %v196_v41 = vmul.f32 %v195_v40, %v181_v36  ;;  %v197_v42 = vmul.f32 %v195_v40, %v182_v37  ;;  %v198_v43 = vmul.f32 %v195_v40, %v183_v38  ;;  %v199_v44 = vmul.f32 %v195_v40, %v184_v39 }
 0x145   :  { %v224_v45 = vmul.f32 %v207_v25, %v196_v41  ;;  %v225_v46 = vmul.f32 %v212_v26, %v197_v42  ;;  %v226_v47 = vmul.f32 %v217_v31, %v198_v43  ;;  %v227_v48 = vmul.f32 %v222_v30, %v199_v44 }
 0x147   :  { %v252_v52 = vadd.f32 %v235_v33, %v224_v45  ;;  %v253_v55 = vadd.f32 %v240_v50, %v225_v46  ;;  %v254_v56 = vadd.f32 %v245_v49, %v226_v47  ;;  %v255_v53 = vadd.f32 %v250_v51, %v227_v48 }
 0x149   :  { %256 = vst [vmem:[%s412_s7] sm:$0xff] %v252_v52 }
 0x14a   :  { %257 = vst [vmem:[%s412_s7 + $0x8] sm:$0xff] %v253_v55 }
 0x14b   :  { %258 = vst [vmem:[%s412_s7 + $0x10] sm:$0xff] %v254_v56 }
 0x14c   :  { %259 = vst [vmem:[%s412_s7 + $0x18] sm:$0xff] %v255_v53 }

</bundles_post_ra>
